<compile_context>
chip_gen: v7x
topology: tpu7x:2x2x1
jax: 0.10.0
libtpu: 0.0.40
codegen_flags: <defaults>
</compile_context>

<pallas_src>
import functools

import jax
import jax.numpy as jnp
from jax.experimental import pallas as pl
from jax.experimental.pallas import tpu as pltpu


# --------------------------- chip-adaptive tuning ---------------------------

def _detect_vmem_bytes():
    try:
        info = pltpu.get_tpu_info()
        cap = getattr(info, "vmem_capacity_bytes", None)
        if cap:
            return int(cap)
    except Exception:
        pass
    return 64 * 1024 * 1024  # conservative (v7x-like) fallback


_VMEM_CAP = _detect_vmem_bytes()
if _VMEM_CAP >= 96 * 1024 * 1024:
    # v5e / v6e: 128 MiB physical VMEM -> larger tiles, higher scoped limit.
    _VMEM_LIMIT = 100 * 1024 * 1024
    _TM, _TN, _TK = 512, 1024, 1024
else:
    # v7x: 64 MiB physical per TC -> keep headroom.
    _VMEM_LIMIT = 48 * 1024 * 1024
    _TM, _TN, _TK = 256, 512, 512

_MAX_SINGLE_K = 4096  # BERT K is at most 3072 -> single K tile, no reduction axis


def _round_up(x, m):
    return (x + m - 1) // m * m


def _pick_tile(dim, pref):
    """Largest tile <= pref (>=128) that evenly divides dim, else the full dim."""
    c = pref
    while c >= 128:
        if dim >= c and dim % c == 0:
            return c
        c //= 2
    return dim


def _pick_row_tile(M, pref):
    """Row (sublane) tile and padded row count so the tile always divides it."""
    if M <= pref:
        t = _round_up(M, 8)
        return t, t
    t = pref
    while t > 128 and M % t != 0:
        t //= 2
    if M % t != 0:
        return t, _round_up(M, t)   # pad instead of falling back to full dim
    return t, M


# --------------------------- fused linear kernels ---------------------------

def _apply_activation(y, activation):
    if activation == "gelu":
        # TODO(synk): HF BERT uses exact erf-GELU; tanh approximation here.
        c = 0.7978845608028654  # sqrt(2/pi)
        y = 0.5 * y * (1.0 + jnp.tanh(c * (y + 0.044715 * y * y * y)))
    elif activation == "tanh":
        y = jnp.tanh(y)
    return y


def _matmul_bias_kernel(x_ref, w_ref, b_ref, o_ref, *, activation):
    # Single-K-tile path: one MXU pass, bias + activation fused, output written once.
    y = jnp.dot(x_ref[...], w_ref[...], preferred_element_type=jnp.float32)
    y = _apply_activation(y + b_ref[...], activation)
    o_ref[...] = y.astype(o_ref.dtype)


def _matmul_acc_kernel(x_ref, w_ref, b_ref, o_ref, acc_ref, *, activation):
    # Fallback for K larger than one tile: f32 VMEM accumulator over k axis.
    @pl.when(pl.program_id(2) == 0)
    def _init():
        acc_ref[...] = jnp.zeros_like(acc_ref)

    acc_ref[...] += jnp.dot(x_ref[...], w_ref[...],
                            preferred_element_type=jnp.float32)

    @pl.when(pl.program_id(2) == pl.num_programs(2) - 1)
    def _finalize():
        y = _apply_activation(acc_ref[...] + b_ref[...], activation)
        o_ref[...] = y.astype(o_ref.dtype)


def linear(x, w, b, activation=None, out_dtype=jnp.bfloat16,
           tm=None, tn=None, tk=None):
    """x: (M, K) @ w: (K, N) + b. bf16 MXU inputs, f32 accumulate, fused epilogue."""
    M, K = x.shape
    N = w.shape[1]
    if x.dtype != jnp.bfloat16:
        x = x.astype(jnp.bfloat16)   # normally a no-op: activations flow as bf16
    if w.dtype != jnp.bfloat16:
        w = w.astype(jnp.bfloat16)   # normally a no-op: weights pre-cast at init
    b2 = b.reshape(1, N).astype(jnp.float32)

    tm, Mp = _pick_row_tile(M, tm or _TM)
    tn = _pick_tile(N, tn or _TN)
    if Mp != M:
        x = jnp.pad(x, ((0, Mp - M), (0, 0)))

    if K <= _MAX_SINGLE_K:
        kern = functools.partial(_matmul_bias_kernel, activation=activation)
        out = pl.pallas_call(
            kern,
            out_shape=jax.ShapeDtypeStruct((Mp, N), out_dtype),
            grid=(Mp // tm, N // tn),
            in_specs=[pl.BlockSpec((tm, K), lambda i, j: (i, 0)),
                      pl.BlockSpec((K, tn), lambda i, j: (0, j)),
                      pl.BlockSpec((1, tn), lambda i, j: (0, j))],
            out_specs=pl.BlockSpec((tm, tn), lambda i, j: (i, j)),
            compiler_params=pltpu.CompilerParams(
                dimension_semantics=("parallel", "parallel"),
                vmem_limit_bytes=_VMEM_LIMIT),
        )(x, w, b2)
    else:
        tk = _pick_tile(K, tk or _TK)
        kern = functools.partial(_matmul_acc_kernel, activation=activation)
        out = pl.pallas_call(
            kern,
            out_shape=jax.ShapeDtypeStruct((Mp, N), out_dtype),
            grid=(Mp // tm, N // tn, K // tk),
            in_specs=[pl.BlockSpec((tm, tk), lambda i, j, k: (i, k)),
                      pl.BlockSpec((tk, tn), lambda i, j, k: (k, j)),
                      pl.BlockSpec((1, tn), lambda i, j, k: (0, j))],
            out_specs=pl.BlockSpec((tm, tn), lambda i, j, k: (i, j)),
            scratch_shapes=[pltpu.VMEM((tm, tn), jnp.float32)],
            compiler_params=pltpu.CompilerParams(
                dimension_semantics=("parallel", "parallel", "arbitrary"),
                vmem_limit_bytes=_VMEM_LIMIT),
        )(x, w, b2)

    return out[:M] if Mp != M else out


# ------------------------ layernorm (+ fused residual) ----------------------

def _ln_kernel(x_ref, g_ref, b_ref, o_ref, *, eps):
    x = x_ref[...].astype(jnp.float32)
    mean = jnp.mean(x, axis=-1, keepdims=True)
    var = jnp.mean(jnp.square(x - mean), axis=-1, keepdims=True)
    inv = jax.lax.rsqrt(var + eps)
    o_ref[...] = ((x - mean) * inv * g_ref[...] + b_ref[...]).astype(o_ref.dtype)


def _ln_add_kernel(x_ref, r_ref, g_ref, b_ref, o_ref, *, eps):
    # fused residual add (saves a full HBM pass per layer)
    x = x_ref[...].astype(jnp.float32) + r_ref[...].astype(jnp.float32)
    mean = jnp.mean(x, axis=-1, keepdims=True)
    var = jnp.mean(jnp.square(x - mean), axis=-1, keepdims=True)
    inv = jax.lax.rsqrt(var + eps)
    o_ref[...] = ((x - mean) * inv * g_ref[...] + b_ref[...]).astype(o_ref.dtype)


def layernorm(x2d, gamma, beta, residual=None, eps=1e-12, tm=1024):
    M, H = x2d.shape
    tm, Mp = _pick_row_tile(M, tm)
    if Mp != M:
        x2d = jnp.pad(x2d, ((0, Mp - M), (0, 0)))
        if residual is not None:
            residual = jnp.pad(residual, ((0, Mp - M), (0, 0)))

    row_spec = pl.BlockSpec((tm, H), lambda i: (i, 0))
    vec_spec = pl.BlockSpec((1, H), lambda i: (0, 0))
    if residual is None:
        kern = functools.partial(_ln_kernel, eps=eps)
        in_specs = [row_spec, vec_spec, vec_spec]
        args = (x2d, gamma.reshape(1, H), beta.reshape(1, H))
    else:
        kern = functools.partial(_ln_add_kernel, eps=eps)
        in_specs = [row_spec, row_spec, vec_spec, vec_spec]
        args = (x2d, residual, gamma.reshape(1, H), beta.reshape(1, H))

    out = pl.pallas_call(
        kern,
        out_shape=jax.ShapeDtypeStruct((Mp, H), jnp.bfloat16),  # bf16 write stream
        grid=(Mp // tm,),
        in_specs=in_specs,
        out_specs=row_spec,
        compiler_params=pltpu.CompilerParams(
            dimension_semantics=("parallel",),
            vmem_limit_bytes=_VMEM_LIMIT),
    )(*args)
    return out[:M] if Mp != M else out


# ----------------------------- attention kernel -----------------------------

def _attention_kernel(qkv_ref, bias_ref, o_ref, *, num_heads, head_dim, hidden):
    """qkv_ref: (S, 3H) bf16 fused Q|K|V; bias_ref: (1, S) f32; o_ref: (S, H) bf16."""
    D, H = head_dim, hidden
    scale = 1.0 / float(D) ** 0.5
    bias = bias_ref[...]                          # (1, S) f32, loaded once (hoisted)
    hpb = 2 if num_heads % 2 == 0 else 1          # head pairs -> 2*D-lane stores

    def one_head(h):
        lo = h * D
        qh = qkv_ref[:, lo:lo + D] * scale        # scale folded into Q (S*D mults)
        kh = qkv_ref[:, H + lo:H + lo + D]
        vh = qkv_ref[:, 2 * H + lo:2 * H + lo + D]
        s = jax.lax.dot_general(                  # bf16 MXU, f32 accumulate
            qh, kh, (((1,), (1,)), ((), ())),
            preferred_element_type=jnp.float32)
        s = s + bias                              # f32 add after f32 accumulation
        m = jnp.max(s, axis=-1, keepdims=True)
        p = jnp.exp(s - m)
        denom = jnp.sum(p, axis=-1, keepdims=True)
        p = p * pl.reciprocal(denom, approx=True)  # EUP slot, off the VPU path
        return jnp.dot(p.astype(qkv_ref.dtype), vh,
                       preferred_element_type=jnp.float32)

    for g in range(num_heads // hpb):
        parts = [one_head(g * hpb + j) for j in range(hpb)]
        blk = parts[0] if hpb == 1 else jnp.concatenate(parts, axis=-1)
        lo = g * hpb * D
        # direct per-pair store into the flat (S, H) layout the output
        # projection consumes -> no full-width concat, no HBM transposes.
        o_ref[:, lo:lo + hpb * D] = blk.astype(o_ref.dtype)


def multihead_attention(qkv2, mask_bias, *, batch, seq, num_heads, hidden):
    """qkv2: (B*S, 3H) bf16 fused slab; mask_bias: (B, 1, S) f32 -> (B*S, H) bf16."""
    M = qkv2.shape[0]
    H = hidden
    kern = functools.partial(_attention_kernel, num_heads=num_heads,
                             head_dim=H // num_heads, hidden=H)
    # TODO(synk): for large B*NH a (batch, head_group) grid would shard better
    # across v7x's two TensorCores; kept (batch,) for BlockSpec simplicity.
    return pl.pallas_call(
        kern,
        out_shape=jax.ShapeDtypeStruct((M, H), jnp.bfloat16),
        grid=(batch,),
        in_specs=[pl.BlockSpec((seq, 3 * H), lambda b: (b, 0)),
                  pl.BlockSpec((None, 1, seq), lambda b: (b, 0, 0))],
        out_specs=pl.BlockSpec((seq, H), lambda b: (b, 0)),
        compiler_params=pltpu.CompilerParams(
            dimension_semantics=("parallel",),
            vmem_limit_bytes=_VMEM_LIMIT),
    )(qkv2, mask_bias)


# -------------------------------- BCE loss ----------------------------------

def _bce_kernel(logits_ref, labels_ref, pw_ref, o_ref):
    x = logits_ref[...]
    y = labels_ref[...]
    pw = pw_ref[...]  # (1, N)
    # PyTorch BCEWithLogitsLoss(pos_weight) stable formulation:
    # loss = (1 - y) * x + (1 + (pw - 1) * y) * softplus(-x)
    log_weight = 1.0 + (pw - 1.0) * y
    softplus_negx = jnp.log1p(jnp.exp(-jnp.abs(x))) + jnp.maximum(-x, 0.0)
    loss = (1.0 - y) * x + log_weight * softplus_negx
    o_ref[...] = jnp.mean(loss, axis=(0, 1), keepdims=True)


def bce_with_logits_loss(logits, labels, pos_weight):
    M, N = logits.shape
    out = pl.pallas_call(
        _bce_kernel,
        out_shape=jax.ShapeDtypeStruct((1, 1), jnp.float32),
        grid=(1,),
        in_specs=[pl.BlockSpec((M, N), lambda i: (0, 0)),
                  pl.BlockSpec((M, N), lambda i: (0, 0)),
                  pl.BlockSpec((1, N), lambda i: (0, 0))],
        out_specs=pl.BlockSpec((1, 1), lambda i: (0, 0)),
    )(logits.astype(jnp.float32), labels, pos_weight.reshape(1, N))
    return out[0, 0]


# ------------------------------- BERT model ---------------------------------

def init_params(key, cfg):
    H, I, NL = cfg["hidden"], cfg["intermediate"], cfg["num_labels"]
    std = 0.02
    ks = iter(jax.random.split(key, 8 + 8 * cfg["num_layers"]))

    def w(shape, dtype=jnp.float32):
        return (jax.random.normal(next(ks), shape, jnp.float32) * std).astype(dtype)

    zeros = lambda s: jnp.zeros(s, jnp.float32)
    ones = lambda s: jnp.ones(s, jnp.float32)

    params = dict(
        word_emb=w((cfg["vocab"], H)),
        pos_emb=w((cfg["max_pos"], H)),
        type_emb=w((2, H)),
        emb_ln_g=ones((H,)), emb_ln_b=zeros((H,)),
        pool_w=w((H, H)), pool_b=zeros((H,)),       # tiny, kept f32 / plain JAX
        cls_w=w((H, NL)), cls_b=zeros((NL,)),
        layers=[],
    )
    bf16 = jnp.bfloat16
    for _ in range(cfg["num_layers"]):
        params["layers"].append(dict(
            # big weights pre-cast to bf16 ONCE -> no per-forward cast traffic
            qkv_w=w((H, 3 * H), bf16), qkv_b=zeros((3 * H,)),   # fused Q | K | V
            ao_w=w((H, H), bf16), ao_b=zeros((H,)),
            ln1_g=ones((H,)), ln1_b=zeros((H,)),
            i_w=w((H, I), bf16), i_b=zeros((I,)),
            o_w=w((I, H), bf16), o_b=zeros((H,)),
            ln2_g=ones((H,)), ln2_b=zeros((H,)),
        ))
    return params


def encoder_layer(x2, p, mask_bias, batch, seq, cfg):
    H = cfg["hidden"]
    NH = cfg["num_heads"]

    # one MXU pass for Q, K, V; the attention kernel consumes the fused slab
    # directly, so no XLA column-split copies are materialized.
    qkv = linear(x2, p["qkv_w"], p["qkv_b"], out_dtype=jnp.bfloat16)
    ctx = multihead_attention(qkv, mask_bias, batch=batch, seq=seq,
                              num_heads=NH, hidden=H)               # (B*S, H) bf16

    attn_out = linear(ctx, p["ao_w"], p["ao_b"], out_dtype=jnp.bfloat16)
    x2 = layernorm(attn_out, p["ln1_g"], p["ln1_b"], residual=x2)    # bf16

    inter = linear(x2, p["i_w"], p["i_b"], activation="gelu",
                   out_dtype=jnp.bfloat16)
    ffn = linear(inter, p["o_w"], p["o_b"], out_dtype=jnp.bfloat16)
    x2 = layernorm(ffn, p["ln2_g"], p["ln2_b"], residual=x2)         # bf16
    return x2


def bert_logits(params, input_ids, attention_mask, cfg):
    B, S = input_ids.shape
    H = cfg["hidden"]

    emb = (jnp.take(params["word_emb"], input_ids, axis=0)
           + params["pos_emb"][:S][None, :, :]
           + params["type_emb"][0][None, None, :])        # token_type_ids = 0
    x2 = layernorm(emb.reshape(B * S, H),
                   params["emb_ln_g"], params["emb_ln_b"])            # bf16

    mask_bias = ((1.0 - attention_mask.astype(jnp.float32)) * -1e9).reshape(B, 1, S)

    for layer_p in params["layers"]:
        x2 = encoder_layer(x2, layer_p, mask_bias, B, S, cfg)

    # Tiny pooler / classifier matmuls: latency-bound, leave them to XLA (f32).
    cls = x2.reshape(B, S, H)[:, 0, :].astype(jnp.float32)
    pooled = jnp.tanh(cls @ params["pool_w"] + params["pool_b"])
    logits = pooled @ params["cls_w"] + params["cls_b"]   # (B, num_labels) f32
    return logits


def bert_multilabel_forward(params, input_ids, attention_mask, cfg,
                            label_weight, labels=None):
    """Mirrors BERTMultiLabelBinaryClassification.forward."""
    logits = bert_logits(params, input_ids, attention_mask, cfg)
    if labels is not None:
        nl = cfg["num_labels"]
        return bce_with_logits_loss(logits.reshape(-1, nl),
                                    labels.reshape(-1, nl).astype(jnp.float32),
                                    label_weight)
    return logits


# ---------------------------------- main -----------------------------------

if __name__ == "__main__":
    cfg = dict(vocab=100, hidden=32, num_heads=4, num_layers=2,
               intermediate=64, max_pos=16, num_labels=3)

    root = jax.random.PRNGKey(0)
    k_param, k_ids, k_lab = jax.random.split(root, 3)
    params = init_params(k_param, cfg)

    B, S = 2, 8
    input_ids = jax.random.randint(k_ids, (B, S), 0, cfg["vocab"], dtype=jnp.int32)
    attention_mask = jnp.ones((B, S), jnp.int32).at[1, 6:].set(0)
    labels = jax.random.bernoulli(k_lab, 0.5, (B, cfg["num_labels"])).astype(jnp.float32)
    label_weight = jnp.array([1.0, 2.0, 0.5], jnp.float32)

    logits = bert_multilabel_forward(params, input_ids, attention_mask, cfg, label_weight)
    loss = bert_multilabel_forward(params, input_ids, attention_mask, cfg,
                                   label_weight, labels=labels)
    jax.block_until_ready((logits, loss))
    assert logits.shape == (B, cfg["num_labels"])
    assert loss.shape == ()
    print("KERNEL_OK")
</pallas_src>

<mosaic_0001>
module attributes {stable_mosaic.version = 11 : i64} {
  func.func @_ln_kernel(%arg0: i32, %arg1: memref<16x32xf32, #tpu.memory_space<vmem>>, %arg2: memref<1x32xf32, #tpu.memory_space<vmem>>, %arg3: memref<1x32xf32, #tpu.memory_space<vmem>>, %arg4: memref<16x32xbf16, #tpu.memory_space<vmem>>) attributes {dimension_semantics = [#tpu.dimension_semantics<parallel>], iteration_bounds = array<i64: 1>, scalar_prefetch = 0 : i64, scratch_operands = 0 : i64, tpu.core_type = #tpu.core_type<tc>, window_params = [{transform_indices = @transform_0, window_bounds = array<i64: 16, 32>}, {pipeline_mode = #tpu.pipeline_mode<synchronous>, transform_indices = @transform_1, window_bounds = array<i64: 1, 32>}, {pipeline_mode = #tpu.pipeline_mode<synchronous>, transform_indices = @transform_2, window_bounds = array<i64: 1, 32>}, {transform_indices = @transform_3, window_bounds = array<i64: 16, 32>}]} {
    %c0 = arith.constant 0 : index
    %c0_0 = arith.constant 0 : index
    %0 = vector.load %arg1[%c0, %c0_0] : memref<16x32xf32, #tpu.memory_space<vmem>>, vector<16x32xf32>
    %cst = arith.constant dense<0.000000e+00> : vector<16xf32>
    %1 = vector.multi_reduction <add>, %0, %cst [1] : vector<16x32xf32> to vector<16xf32>
    %2 = vector.shape_cast %1 : vector<16xf32> to vector<16x1xf32>
    %cst_1 = arith.constant 3.200000e+01 : f32
    %3 = vector.broadcast %cst_1 : f32 to vector<16x1xf32>
    %4 = arith.divf %2, %3 : vector<16x1xf32>
    %5 = vector.broadcast %4 : vector<16x1xf32> to vector<16x32xf32>
    %6 = arith.subf %0, %5 : vector<16x32xf32>
    %7 = arith.mulf %6, %6 : vector<16x32xf32>
    %cst_2 = arith.constant dense<0.000000e+00> : vector<16xf32>
    %8 = vector.multi_reduction <add>, %7, %cst_2 [1] : vector<16x32xf32> to vector<16xf32>
    %9 = vector.shape_cast %8 : vector<16xf32> to vector<16x1xf32>
    %cst_3 = arith.constant 3.200000e+01 : f32
    %10 = vector.broadcast %cst_3 : f32 to vector<16x1xf32>
    %11 = arith.divf %9, %10 : vector<16x1xf32>
    %cst_4 = arith.constant 9.99999996E-13 : f32
    %12 = vector.broadcast %cst_4 : f32 to vector<16x1xf32>
    %13 = arith.addf %11, %12 : vector<16x1xf32>
    %14 = math.rsqrt %13 : vector<16x1xf32>
    %15 = vector.broadcast %4 : vector<16x1xf32> to vector<16x32xf32>
    %16 = arith.subf %0, %15 : vector<16x32xf32>
    %17 = vector.broadcast %14 : vector<16x1xf32> to vector<16x32xf32>
    %18 = arith.mulf %16, %17 : vector<16x32xf32>
    %c0_5 = arith.constant 0 : index
    %c0_6 = arith.constant 0 : index
    %19 = vector.load %arg2[%c0_5, %c0_6] : memref<1x32xf32, #tpu.memory_space<vmem>>, vector<1x32xf32>
    %20 = vector.broadcast %19 : vector<1x32xf32> to vector<16x32xf32>
    %21 = arith.mulf %18, %20 : vector<16x32xf32>
    %c0_7 = arith.constant 0 : index
    %c0_8 = arith.constant 0 : index
    %22 = vector.load %arg3[%c0_7, %c0_8] : memref<1x32xf32, #tpu.memory_space<vmem>>, vector<1x32xf32>
    %23 = vector.broadcast %22 : vector<1x32xf32> to vector<16x32xf32>
    %24 = arith.addf %21, %23 : vector<16x32xf32>
    %25 = arith.truncf %24 : vector<16x32xf32> to vector<16x32xbf16>
    %c0_9 = arith.constant 0 : index
    %c0_10 = arith.constant 0 : index
    %26 = vector.load %arg4[%c0_9, %c0_10] : memref<16x32xbf16, #tpu.memory_space<vmem>>, vector<16x32xbf16>
    tpu.vector_store %arg4[%c0_9, %c0_10], %25 {strides = array<i32>} : memref<16x32xbf16, #tpu.memory_space<vmem>>, vector<16x32xbf16>,
    return
  }
  func.func @transform_0(%arg0: i32) -> (i32, i32) {
    %c0_i32 = arith.constant 0 : i32
    %c0_i32_0 = arith.constant 0 : i32
    return %arg0, %c0_i32 : i32, i32
  }
  func.func @transform_1(%arg0: i32) -> (i32, i32) {
    %c0_i32 = arith.constant 0 : i32
    %c0_i32_0 = arith.constant 0 : i32
    %c0_i32_1 = arith.constant 0 : i32
    return %c0_i32, %c0_i32_0 : i32, i32
  }
  func.func @transform_2(%arg0: i32) -> (i32, i32) {
    %c0_i32 = arith.constant 0 : i32
    %c0_i32_0 = arith.constant 0 : i32
    %c0_i32_1 = arith.constant 0 : i32
    return %c0_i32, %c0_i32_0 : i32, i32
  }
  func.func @transform_3(%arg0: i32) -> (i32, i32) {
    %c0_i32 = arith.constant 0 : i32
    %c0_i32_0 = arith.constant 0 : i32
    return %arg0, %c0_i32 : i32, i32
  }
}

</mosaic_0001>

<bundles_post_ra>
// kernel: tpu_custom_call.1
= control target key start
LH: loop header
LB: loop body
LE: loop exit
PB: predicated region body
PF: predicated region fallthrough
CT: control target
= control target key end

     0   :  { %8 = vsyncpa [#allocation3], 0  ;;  %s229_s0 = inlined_call_operand.hbm [shape: f32[16,32], index: 0, kind: input, shape index: {}]   ;;  %s230_s1 = inlined_call_operand.vmem [shape: f32[1,32], index: 1, kind: input, shape index: {}]   ;;  %s231_s2 = inlined_call_operand.vmem [shape: f32[1,32], index: 2, kind: input, shape index: {}]   ;;  %s232_s3 = inlined_call_operand.hbm [shape: bf16[16,32], index: 3, kind: output, shape index: {}]  }
   0x1   :  { %9 = vsyncpa [#allocation4], 0  ;;  %s169_s12 = smov [#allocation2]   ;;  %s121_s16 = scalar_lea.hbm %s229_s0, 256 }
   0x2   :  { %s15_s13 = sshll.u32 %s169_s12, 4  ;;  %p122_p0 = scmp.ne.s32.totalorder %s229_s0, %s121_s16  ;;  %s16_s13 = int_to_ptr.vmem [resolvable:$true] %s15_s13 }
   0x3   :  { %p125_p1 = scmp.lt.u32.totalorder %s121_s16, %s229_s0 }
   0x5   :  { %p127_p2 = pnand %p125_p1, %p122_p0 }
   0x7   :  { %130 = shalt.err (!%p127_p2)
}
   0x8   :  { %s131_s21 = scalar_lea.vmem %s16_s13, 256  ;;  %p136_p4 = scmp.lt.s32.totalorder %s16_s13, %s16_s13 }
   0x9   :  { %p132_p3 = scmp.ne.s32.totalorder %s16_s13, %s131_s21  ;;  %p137_p5 = scmp.lt.s32.totalorder %s131_s21, %s131_s21 }
   0xb   :  { %p138_p6 = por %p137_p5, %p136_p4 }
   0xd   :  { %p139_p7 = pnand %p138_p6, %p132_p3 }
   0xf   :  { %142 = shalt.err (!%p139_p7)
}
  0x10   :  { %s170_s22 = smov 128   ;;  %s171_s23 = smov 8  }
  0x11   :  { %21 = dma.hbm_to_vmem [thread:$0]  %s229_s0, 256, %s16_s13, [#allocation3], %s170_s22, %s170_s22, %s171_s23  }
  0x12   :  { %165 = dma.done.wait [#allocation3], 256  }
  0x13   :  { %166 = vsyncadd [#allocation3], 4294967040  ;;  %vm31_vm0 = vcmask 261120   ;;  %v29_v0 = vld [vmem:[#allocation2] sm:$0xff]  ;;  %v30_v1 = vld [vmem:[#allocation2 + $0x8] sm:$0xff]  ;;  %vm85_vm1 = vcmask 257024  }
  0x14   :  { %v32_v2 = vsel %vm31_vm0, %v29_v0, 0.0  ;;  %v35_v3 = vsel %vm31_vm0, %v30_v1, 0.0  ;;  %v105_v21 = vld [vmem:[%s230_s1] ss:$0 sm:$0xff]  ;;  %s172_s29 = smov [#allocation5]  }
  0x15   :  { %33 = vadd.xlane.f32.xlu0 %v32_v2  ;;  %v106_v23 = vld [vmem:[%s231_s2] ss:$0 sm:$0xff]  ;;  %s93_s30 = sshll.u32 %s172_s29, 4  ;;  %s94_s30 = int_to_ptr.vmem [resolvable:$true] %s93_s30 }
  0x16   :  { %s143_s1 = scalar_lea.vmem %s94_s30, 128  ;;  %p148_p9 = scmp.lt.s32.totalorder %s94_s30, %s94_s30 }
  0x17   :  { %p144_p8 = scmp.ne.s32.totalorder %s94_s30, %s143_s1  ;;  %p149_p10 = scmp.lt.s32.totalorder %s143_s1, %s143_s1 }
  0x19   :  { %36 = vadd.xlane.f32.xlu0 %v35_v3  ;;  %p150_p11 = por %p149_p10, %p148_p9 }
  0x1b   :  { %p151_p12 = pnand %p150_p11, %p144_p8 }
  0xa2   :  { %v34_v4 = vpop.xlane.xlu0 %33 }
  0xa3   :  { %v39_v5 = vmul.f32 0.03125, %v34_v4 }
  0xa5   :  { %v41_v6 = vsub.f32 %v29_v0, %v39_v5 }
  0xa6   :  { %v37_v7 = vpop.xlane.xlu0 %36 }
  0xa7   :  { %v40_v8 = vmul.f32 0.03125, %v37_v7  ;;  %v43_v9 = vmul.f32 %v41_v6, %v41_v6 }
  0xa9   :  { %v42_v10 = vsub.f32 %v30_v1, %v40_v8  ;;  %v45_v11 = vsel %vm31_vm0, %v43_v9, 0.0 }
  0xaa   :  { %46 = vadd.xlane.f32.xlu1 %v45_v11 }
  0xab   :  { %v44_v12 = vmul.f32 %v42_v10, %v42_v10 }
  0xad   :  { %v48_v13 = vsel %vm31_vm0, %v44_v12, 0.0 }
  0xae   :  { %49 = vadd.xlane.f32.xlu1 %v48_v13 }
 0x137   :  { %v47_v14 = vpop.xlane.xlu1 %46 }
 0x138   :  { %v51_v15 = vmul.f32 0.03125, %v47_v14 }
 0x13a   :  { %v53_v16 = vadd.f32 1e-12, %v51_v15 }
 0x13b   :  { %v50_v17 = vpop.xlane.xlu1 %49 }
 0x13c   :  { %117 = vrsqrt.f32 %v53_v16  ;;  %v52_v18 = vmul.f32 0.03125, %v50_v17 }
 0x13e   :  { %v54_v19 = vadd.f32 1e-12, %v52_v18 }
 0x140   :  { %119 = vrsqrt.f32 %v54_v19 }
 0x146   :  { %v118_v20 = vpop.eup %117 }
 0x147   :  { %v57_v22 = vmul.f32 %v118_v20, %v41_v6 }
 0x149   :  { %v66_v24 = vmul.f32 %v105_v21, %v57_v22 }
 0x14a   :  { %v120_v25 = vpop.eup %119 }
 0x14b   :  { %v58_v26 = vmul.f32 %v120_v25, %v42_v10  ;;  %v75_v27 = vadd.f32 %v106_v23, %v66_v24 }
 0x14d   :  { %v67_v28 = vmul.f32 %v105_v21, %v58_v26  ;;  %v109_v29 = vpack.c.bf16 %v75_v27, %v75_v27 }
 0x14f   :  { %v76_v30 = vadd.f32 %v106_v23, %v67_v28  ;;  %86 = vst.msk [vmem:[#allocation5] sm:$0xf] %vm85_vm1, %v109_v29 }
 0x151   :  { %v110_v31 = vpack.c.bf16 %v76_v30, %v76_v30 }
 0x153   :  { %87 = vst.msk [vmem:[#allocation5 + $0x4] sm:$0xf] %vm85_vm1, %v110_v31 }
 0x154   :  { %154 = shalt.err (!%p151_p12)
}
 0x155   :  { %s155_s5 = scalar_lea.hbm %s232_s3, 128 }
 0x156   :  { %p156_p13 = scmp.ne.s32.totalorder %s232_s3, %s155_s5  ;;  %p159_p0 = scmp.lt.u32.totalorder %s155_s5, %s232_s3 }
 0x158   :  { %p161_p1 = pnand %p159_p0, %p156_p13 }
 0x15a   :  { %164 = shalt.err (!%p161_p1)
}
 0x15b   :  { %s173_s10 = smov 64   ;;  %s174_s11 = smov 4  }
 0x15c   :  { %99 = dma.vmem_to_hbm [thread:$0]  %s94_s30, 128, %s232_s3, [#allocation4], %s173_s10, %s173_s10, %s174_s11  }
 0x15d   :  { %167 = dma.done.wait [#allocation4], 128  }
 0x15e   :  { %168 = vsyncadd [#allocation4], 4294967168 }
 0x15f   :  { %103 = vsyncpa [#allocation3], 1 }
 0x160   :  { %104 = vsyncpa [#allocation4], 1 }

</bundles_post_ra>
